<compile_context>
chip_gen: v5e
topology: v5e:2x2
jax: 0.10.0
libtpu: 0.0.40
codegen_flags: <defaults>
</compile_context>

<pallas_src>
import jax
import jax.numpy as jnp
from jax.experimental import pallas as pl
from jax.experimental.pallas import tpu as pltpu


def _round_up(x, m):
    return ((x + m - 1) // m) * m


def gate_kernel(inst_ref, glob_ref, w1a_ref, w1b_ref, b1_ref, w2_ref, b2_ref,
                out_ref):
    """One (TILE_N, F) row tile of the attention gate.

    h    = leaky_relu(inst @ W1[:F] + glob @ W1[F:] + b1)   (no concat)
    gate = sum(h * w2_row, axis=-1) + b2                    (VPU/XLU, not MXU)
    gates are stored lane-dense as a (1, TILE_N) block.
    """
    # Two K=F matmuls into one f32 accumulator replace concat([inst, glob]) @ W1.
    h = jnp.dot(inst_ref[...], w1a_ref[...], preferred_element_type=jnp.float32)
    h = h + jnp.dot(glob_ref[...], w1b_ref[...], preferred_element_type=jnp.float32)
    h = h + b1_ref[...]
    # LeakyReLU (PyTorch default negative_slope = 0.01).
    h = jnp.where(h > 0, h, 0.01 * h)
    # F -> 1 projection as elementwise multiply + lane reduction (keeps the MXU
    # free and avoids a 1-lane-wide result tile / masked column stores).
    gate = jnp.sum(h * w2_ref[...], axis=-1) + b2_ref[0, 0]          # (TILE_N,)
    out_ref[...] = gate.reshape(1, -1).astype(out_ref.dtype)


def instance_attention_gate(instance_feature, global_feature, w1, b1, w2, b2,
                            *, tile_n=2048):
    n, f = instance_feature.shape
    assert global_feature.shape == (n, f)
    assert w1.shape == (2 * f, f) and b1.shape == (f,)
    assert w2.shape == (f, 1) and b2.shape == (1,)

    # Split W1 so the kernel never concatenates along the lane axis.
    w1a = w1[:f]                      # applied to instance_feature
    w1b = w1[f:]                      # applied to global_feature
    b1_2d = b1.reshape(1, f)
    w2_row = w2.reshape(1, f)
    b2_2d = b2.reshape(1, 1)

    # Row tile: multiple of 128 so the lane-dense (1, TILE_N) output block is
    # aligned. Rows are padded up to the tile size and dropped afterwards.
    tile_n = max(128, min(_round_up(tile_n, 128), _round_up(n, 128)))
    n_pad = _round_up(n, tile_n)
    if n_pad != n:
        pad = ((0, n_pad - n), (0, 0))
        instance_feature = jnp.pad(instance_feature, pad)
        global_feature = jnp.pad(global_feature, pad)
    num_tiles = n_pad // tile_n

    pinned = lambda shape: pl.BlockSpec(shape, lambda i: (0,) * len(shape))

    grid_spec = pltpu.PrefetchScalarGridSpec(
        num_scalar_prefetch=0,
        grid=(num_tiles,),
        in_specs=[
            pl.BlockSpec((tile_n, f), lambda i: (i, 0)),        # instance rows
            pl.BlockSpec((tile_n, f), lambda i: (i, 0)),        # global rows
            pinned((f, f)),                                     # W1[:F]
            pinned((f, f)),                                     # W1[F:]
            pinned((1, f)),                                     # b1
            pinned((1, f)),                                     # w2 as a row
            pl.BlockSpec(memory_space=pltpu.MemorySpace.SMEM),  # b2 scalar
        ],
        out_specs=pl.BlockSpec((1, tile_n), lambda i: (0, i)),  # lane-dense gates
    )

    itemsize = 4  # float32
    cost = pl.CostEstimate(
        flops=4 * n_pad * f * f + 2 * n_pad * f,
        transcendentals=0,
        bytes_accessed=(2 * n_pad * f + n_pad + 2 * f * f + 3 * f + 1) * itemsize,
    )

    out = pl.pallas_call(
        gate_kernel,
        out_shape=jax.ShapeDtypeStruct((1, n_pad), jnp.float32),
        grid_spec=grid_spec,
        compiler_params=pltpu.CompilerParams(
            dimension_semantics=("parallel",)),
        cost_estimate=cost,
    )(instance_feature, global_feature, w1a, w1b, b1_2d, w2_row, b2_2d)

    # (1, n_pad) lane-dense slab -> (N, 1) to match the PyTorch module output.
    return out[0, :n].reshape(n, 1)
    # TODO(synk): optional bf16 cast of streamed inputs/W1 (v5e bandwidth win)
    # left out to preserve f32 numerics of the reference module.


def reference(instance_feature, global_feature, w1, b1, w2, b2):
    feat = jnp.concatenate([instance_feature, global_feature], axis=1)
    h = feat @ w1 + b1
    h = jnp.where(h > 0, h, 0.01 * h)
    return h @ w2 + b2


if __name__ == "__main__":
    key = jax.random.PRNGKey(0)
    N, FEAT = 8, 32  # batch of 8 instances, feat_dim = 32

    k1, k2, k3, k4, k5, k6 = jax.random.split(key, 6)
    instance_feature = jax.random.normal(k1, (N, FEAT), dtype=jnp.float32)
    global_feature = jax.random.normal(k2, (N, FEAT), dtype=jnp.float32)

    # Deterministic parameter init (synthetic; mimics Linear layer shapes).
    w1 = jax.random.normal(k3, (2 * FEAT, FEAT), dtype=jnp.float32) * 0.05
    b1 = jax.random.normal(k4, (FEAT,), dtype=jnp.float32) * 0.05
    w2 = jax.random.normal(k5, (FEAT, 1), dtype=jnp.float32) * 0.05
    b2 = jax.random.normal(k6, (1,), dtype=jnp.float32) * 0.05

    out = instance_attention_gate(instance_feature, global_feature, w1, b1, w2, b2)
    out = jax.block_until_ready(out)

    ref = reference(instance_feature, global_feature, w1, b1, w2, b2)
    assert out.shape == (N, 1)
    # The reference's h @ w2 runs on the MXU at default (bf16-pass) precision,
    # while the kernel's F->1 projection is an exact f32 VPU reduce; allow for
    # that expected ~1e-3-level divergence.
    assert jnp.allclose(out, ref, atol=1e-2, rtol=1e-2), float(jnp.max(jnp.abs(out - ref)))

    print("KERNEL_OK")
</pallas_src>

<mosaic_0001>
module attributes {stable_mosaic.version = 11 : i64} {
  func.func @gate_kernel(%arg0: i32, %arg1: memref<128x32xf32, #tpu.memory_space<vmem>>, %arg2: memref<128x32xf32, #tpu.memory_space<vmem>>, %arg3: memref<32x32xf32, #tpu.memory_space<vmem>>, %arg4: memref<32x32xf32, #tpu.memory_space<vmem>>, %arg5: memref<1x32xf32, #tpu.memory_space<vmem>>, %arg6: memref<1x32xf32, #tpu.memory_space<vmem>>, %arg7: memref<1x1xf32, #tpu.memory_space<smem>>, %arg8: memref<1x128xf32, #tpu.memory_space<vmem>>) attributes {dimension_semantics = [#tpu.dimension_semantics<parallel>], iteration_bounds = array<i64: 1>, scalar_prefetch = 0 : i64, scratch_operands = 0 : i64, tpu.core_type = #tpu.core_type<tc>, window_params = [{transform_indices = @transform_0, window_bounds = array<i64: 128, 32>}, {transform_indices = @transform_1, window_bounds = array<i64: 128, 32>}, {pipeline_mode = #tpu.pipeline_mode<synchronous>, transform_indices = @transform_2, window_bounds = array<i64: 32, 32>}, {pipeline_mode = #tpu.pipeline_mode<synchronous>, transform_indices = @transform_3, window_bounds = array<i64: 32, 32>}, {pipeline_mode = #tpu.pipeline_mode<synchronous>, transform_indices = @transform_4, window_bounds = array<i64: 1, 32>}, {pipeline_mode = #tpu.pipeline_mode<synchronous>, transform_indices = @transform_5, window_bounds = array<i64: 1, 32>}, {transform_indices = @transform_6, window_bounds = array<i64: 1, 1>}, {transform_indices = @transform_7, window_bounds = array<i64: 1, 128>}]} {
    %c0 = arith.constant 0 : index
    %c0_0 = arith.constant 0 : index
    %0 = vector.load %arg1[%c0, %c0_0] : memref<128x32xf32, #tpu.memory_space<vmem>>, vector<128x32xf32>
    %c0_1 = arith.constant 0 : index
    %c0_2 = arith.constant 0 : index
    %1 = vector.load %arg3[%c0_1, %c0_2] : memref<32x32xf32, #tpu.memory_space<vmem>>, vector<32x32xf32>
    %cst = arith.constant dense<0.000000e+00> : vector<128x32xf32>
    %2 = tpu.matmul %0, %1, %cst {dimension_numbers = #tpu.dot_dimension_numbers<[1], [0], [0], [1], [0, 0, 1, 1], [], []>} : vector<128x32xf32>, vector<32x32xf32>, vector<128x32xf32> -> vector<128x32xf32>
    %c0_3 = arith.constant 0 : index
    %c0_4 = arith.constant 0 : index
    %3 = vector.load %arg2[%c0_3, %c0_4] : memref<128x32xf32, #tpu.memory_space<vmem>>, vector<128x32xf32>
    %c0_5 = arith.constant 0 : index
    %c0_6 = arith.constant 0 : index
    %4 = vector.load %arg4[%c0_5, %c0_6] : memref<32x32xf32, #tpu.memory_space<vmem>>, vector<32x32xf32>
    %cst_7 = arith.constant dense<0.000000e+00> : vector<128x32xf32>
    %5 = tpu.matmul %3, %4, %cst_7 {dimension_numbers = #tpu.dot_dimension_numbers<[1], [0], [0], [1], [0, 0, 1, 1], [], []>} : vector<128x32xf32>, vector<32x32xf32>, vector<128x32xf32> -> vector<128x32xf32>
    %6 = arith.addf %2, %5 : vector<128x32xf32>
    %c0_8 = arith.constant 0 : index
    %c0_9 = arith.constant 0 : index
    %7 = vector.load %arg5[%c0_8, %c0_9] : memref<1x32xf32, #tpu.memory_space<vmem>>, vector<1x32xf32>
    %8 = vector.broadcast %7 : vector<1x32xf32> to vector<128x32xf32>
    %9 = arith.addf %6, %8 : vector<128x32xf32>
    %cst_10 = arith.constant 0.000000e+00 : f32
    %10 = vector.broadcast %cst_10 : f32 to vector<128x32xf32>
    %11 = arith.cmpf ogt, %9, %10 : vector<128x32xf32>
    %cst_11 = arith.constant 0.00999999977 : f32
    %12 = vector.broadcast %cst_11 : f32 to vector<128x32xf32>
    %13 = arith.mulf %12, %9 : vector<128x32xf32>
    %14 = arith.select %11, %9, %13 : vector<128x32xi1>, vector<128x32xf32>
    %c0_12 = arith.constant 0 : index
    %c0_13 = arith.constant 0 : index
    %15 = vector.load %arg6[%c0_12, %c0_13] : memref<1x32xf32, #tpu.memory_space<vmem>>, vector<1x32xf32>
    %16 = vector.broadcast %15 : vector<1x32xf32> to vector<128x32xf32>
    %17 = arith.mulf %14, %16 : vector<128x32xf32>
    %cst_14 = arith.constant dense<0.000000e+00> : vector<128xf32>
    %18 = vector.multi_reduction <add>, %17, %cst_14 [1] : vector<128x32xf32> to vector<128xf32>
    %c0_15 = arith.constant 0 : index
    %c0_16 = arith.constant 0 : index
    %19 = memref.load %arg7[%c0_15, %c0_16] : memref<1x1xf32, #tpu.memory_space<smem>>
    %20 = vector.broadcast %19 : f32 to vector<128xf32>
    %21 = arith.addf %18, %20 : vector<128xf32>
    %22 = vector.shape_cast %21 : vector<128xf32> to vector<1x128xf32>
    %c0_17 = arith.constant 0 : index
    %c0_18 = arith.constant 0 : index
    %23 = vector.load %arg8[%c0_17, %c0_18] : memref<1x128xf32, #tpu.memory_space<vmem>>, vector<1x128xf32>
    tpu.vector_store %arg8[%c0_17, %c0_18], %22 {strides = array<i32>} : memref<1x128xf32, #tpu.memory_space<vmem>>, vector<1x128xf32>,
    return
  }
  func.func @transform_0(%arg0: i32) -> (i32, i32) {
    %c0_i32 = arith.constant 0 : i32
    %c0_i32_0 = arith.constant 0 : i32
    return %arg0, %c0_i32 : i32, i32
  }
  func.func @transform_1(%arg0: i32) -> (i32, i32) {
    %c0_i32 = arith.constant 0 : i32
    %c0_i32_0 = arith.constant 0 : i32
    return %arg0, %c0_i32 : i32, i32
  }
  func.func @transform_2(%arg0: i32) -> (i32, i32) {
    %c0_i32 = arith.constant 0 : i32
    %c0_i32_0 = arith.constant 0 : i32
    %c0_i32_1 = arith.constant 0 : i32
    return %c0_i32, %c0_i32_0 : i32, i32
  }
  func.func @transform_3(%arg0: i32) -> (i32, i32) {
    %c0_i32 = arith.constant 0 : i32
    %c0_i32_0 = arith.constant 0 : i32
    %c0_i32_1 = arith.constant 0 : i32
    return %c0_i32, %c0_i32_0 : i32, i32
  }
  func.func @transform_4(%arg0: i32) -> (i32, i32) {
    %c0_i32 = arith.constant 0 : i32
    %c0_i32_0 = arith.constant 0 : i32
    %c0_i32_1 = arith.constant 0 : i32
    return %c0_i32, %c0_i32_0 : i32, i32
  }
  func.func @transform_5(%arg0: i32) -> (i32, i32) {
    %c0_i32 = arith.constant 0 : i32
    %c0_i32_0 = arith.constant 0 : i32
    %c0_i32_1 = arith.constant 0 : i32
    return %c0_i32, %c0_i32_0 : i32, i32
  }
  func.func @transform_6(%arg0: i32) -> (i32, i32) {
    %c0_i32 = arith.constant 0 : i32
    %c0_i32_0 = arith.constant 0 : i32
    %c0_i32_1 = arith.constant 0 : i32
    return %c0_i32, %c0_i32_0 : i32, i32
  }
  func.func @transform_7(%arg0: i32) -> (i32, i32) {
    %c0_i32 = arith.constant 0 : i32
    %c0_i32_0 = arith.constant 0 : i32
    return %c0_i32, %arg0 : i32, i32
  }
}

</mosaic_0001>

<bundles_post_ra>
// kernel: tpu_custom_call.1
= control target key start
LH: loop header
LB: loop body
LE: loop exit
PB: predicated region body
PF: predicated region fallthrough
CT: control target
= control target key end

     0   :  { %vm68_vm0 = vcmask 261120   ;;  %s908_s0 = inlined_call_operand.vmem [shape: f32[128,32], index: 0, kind: input, shape index: {}]   ;;  %s909_s1 = inlined_call_operand.vmem [shape: f32[128,32], index: 1, kind: input, shape index: {}]   ;;  %s910_s2 = inlined_call_operand.vmem [shape: f32[32,32], index: 2, kind: input, shape index: {}]   ;;  %s911_s3 = inlined_call_operand.vmem [shape: f32[32,32], index: 3, kind: input, shape index: {}]   ;;  %s912_s4 = inlined_call_operand.vmem [shape: f32[1,32], index: 4, kind: input, shape index: {}]   ;;  %s913_s5 = inlined_call_operand.vmem [shape: f32[1,32], index: 5, kind: input, shape index: {}]   ;;  %s914_s6 = inlined_call_operand.<no memory space> [shape: f32[1,1], index: 6, kind: input, shape index: {}]   ;;  %s915_s7 = inlined_call_operand.hbm [shape: f32[1,128], index: 7, kind: output, shape index: {}]  }
   0x1   :  { %v67_v0 = vld [vmem:[%s911_s3 + $0x18] sm:$0xff]  ;;  %v66_v2 = vld [vmem:[%s911_s3 + $0x10] sm:$0xff]  ;;  %v65_v4 = vld [vmem:[%s911_s3 + $0x8] sm:$0xff] }
   0x2   :  { %v47_v1 = vld [vmem:[%s910_s2 + $0x18] sm:$0xff]  ;;  %129 = vmatpush.msra.mxu0 %v67_v0  ;;  %v46_v3 = vld [vmem:[%s910_s2 + $0x10] sm:$0xff]  ;;  %578 = vmatpush.msra.mxu2 %v67_v0  ;;  %v45_v5 = vld [vmem:[%s910_s2 + $0x8] sm:$0xff] }
   0x3   :  { %242 = vmatpush.msra.mxu1 %v47_v1  ;;  %582 = vmatpush.msra.mxu3 %v47_v1  ;;  %v64_v6 = vld [vmem:[%s911_s3] sm:$0xff] }
   0x4   :  { %130 = vmatpush.msra.mxu0 %v66_v2  ;;  %579 = vmatpush.msra.mxu2 %v66_v2  ;;  %v44_v7 = vld [vmem:[%s910_s2] sm:$0xff] }
   0x5   :  { %243 = vmatpush.msra.mxu1 %v46_v3  ;;  %583 = vmatpush.msra.mxu3 %v46_v3  ;;  %v48_v8 = vld [vmem:[%s909_s1] sm:$0xff] }
   0x6   :  { %131 = vmatpush.msra.mxu0 %v65_v4  ;;  %v28_v9 = vld [vmem:[%s908_s0] sm:$0xff]  ;;  %580 = vmatpush.msra.mxu2 %v65_v4 }
   0x7   :  { %244 = vmatpush.msra.mxu1 %v45_v5  ;;  %584 = vmatpush.msra.mxu3 %v45_v5  ;;  %v56_v10 = vld [vmem:[%s909_s1 + $0x40] sm:$0xff] }
   0x8   :  { %132 = vmatpush.msra.mxu0 %v64_v6  ;;  %v36_v11 = vld [vmem:[%s908_s0 + $0x40] sm:$0xff]  ;;  %581 = vmatpush.msra.mxu2 %v64_v6 }
   0x9   :  { %245 = vmatpush.msra.mxu1 %v44_v7  ;;  %546 = vmatmul.msk.f32.vlgmr.msra.gmra.mxu0 %vm68_vm0, %v48_v8 }
   0xa   :  { %562 = vmatmul.msk.f32.vlgmr.msra.gmra.mxu1 %vm68_vm0, %v28_v9  ;;  %585 = vmatpush.msra.mxu3 %v44_v7 }
   0xb   :  { %554 = vmatmul.msk.f32.vlgmr.msra.gmra.mxu2 %vm68_vm0, %v56_v10  ;;  %570 = vmatmul.msk.f32.vlgmr.msra.gmra.mxu3 %vm68_vm0, %v36_v11 }
   0xc   :  { %13 = vsyncpa [#allocation4], 0  ;;  %v49_v12 = vld [vmem:[%s909_s1 + $0x8] sm:$0xff]  ;;  %v50_v16 = vld [vmem:[%s909_s1 + $0x10] sm:$0xff]  ;;  %s537_s11 = sshll.u32 %s915_s7, 4  ;;  %s538_s11 = int_to_ptr.hbm [resolvable:$true] %s537_s11 }
   0xd   :  { %v29_v13 = vld [vmem:[%s908_s0 + $0x8] sm:$0xff]  ;;  %v30_v17 = vld [vmem:[%s908_s0 + $0x10] sm:$0xff]  ;;  %v51_v20 = vld [vmem:[%s909_s1 + $0x18] sm:$0xff] }
   0xe   :  { %v57_v14 = vld [vmem:[%s909_s1 + $0x48] sm:$0xff]  ;;  %v58_v18 = vld [vmem:[%s909_s1 + $0x50] sm:$0xff]  ;;  %v31_v21 = vld [vmem:[%s908_s0 + $0x18] sm:$0xff] }
   0xf   :  { %v37_v15 = vld [vmem:[%s908_s0 + $0x48] sm:$0xff]  ;;  %v38_v19 = vld [vmem:[%s908_s0 + $0x50] sm:$0xff]  ;;  %v59_v22 = vld [vmem:[%s909_s1 + $0x58] sm:$0xff] }
  0x10   :  { %v39_v23 = vld [vmem:[%s908_s0 + $0x58] sm:$0xff]  ;;  %v52_v24 = vld [vmem:[%s909_s1 + $0x20] sm:$0xff]  ;;  %v53_v28 = vld [vmem:[%s909_s1 + $0x28] sm:$0xff] }
  0x11   :  { %547 = vmatmul.msk.f32.gmra.mxu0 %vm68_vm0, %v49_v12  ;;  %v32_v25 = vld [vmem:[%s908_s0 + $0x20] sm:$0xff]  ;;  %v33_v29 = vld [vmem:[%s908_s0 + $0x28] sm:$0xff]  ;;  %v54_v32 = vld [vmem:[%s909_s1 + $0x30] sm:$0xff] }
  0x12   :  { %563 = vmatmul.msk.f32.gmra.mxu1 %vm68_vm0, %v29_v13  ;;  %v60_v26 = vld [vmem:[%s909_s1 + $0x60] sm:$0xff]  ;;  %v61_v30 = vld [vmem:[%s909_s1 + $0x68] sm:$0xff]  ;;  %v34_v33 = vld [vmem:[%s908_s0 + $0x30] sm:$0xff] }
  0x13   :  { %555 = vmatmul.msk.f32.gmra.mxu2 %vm68_vm0, %v57_v14  ;;  %571 = vmatmul.msk.f32.gmra.mxu3 %vm68_vm0, %v37_v15  ;;  %v40_v27 = vld [vmem:[%s908_s0 + $0x60] sm:$0xff]  ;;  %v41_v31 = vld [vmem:[%s908_s0 + $0x68] sm:$0xff]  ;;  %v62_v34 = vld [vmem:[%s909_s1 + $0x70] sm:$0xff] }
  0x14   :  { %v42_v35 = vld [vmem:[%s908_s0 + $0x70] sm:$0xff]  ;;  %v55_v36 = vld [vmem:[%s909_s1 + $0x38] sm:$0xff]  ;;  %v811_v40 = vld [vmem:[%s912_s4] ss:$0 sm:$0xff] }
  0x15   :  { %v35_v37 = vld [vmem:[%s908_s0 + $0x38] sm:$0xff]  ;;  %v817_v45 = vld [vmem:[%s913_s5] ss:$0 sm:$0xff] }
  0x16   :  { %v63_v38 = vld [vmem:[%s909_s1 + $0x78] sm:$0xff] }
  0x17   :  { %v43_v39 = vld [vmem:[%s908_s0 + $0x78] sm:$0xff] }
  0x19   :  { %548 = vmatmul.msk.f32.gmra.mxu0 %vm68_vm0, %v50_v16 }
  0x1a   :  { %564 = vmatmul.msk.f32.gmra.mxu1 %vm68_vm0, %v30_v17 }
  0x1b   :  { %556 = vmatmul.msk.f32.gmra.mxu2 %vm68_vm0, %v58_v18  ;;  %572 = vmatmul.msk.f32.gmra.mxu3 %vm68_vm0, %v38_v19 }
  0x21   :  { %549 = vmatmul.msk.f32.gmra.mxu0 %vm68_vm0, %v51_v20 }
  0x22   :  { %565 = vmatmul.msk.f32.gmra.mxu1 %vm68_vm0, %v31_v21 }
  0x23   :  { %557 = vmatmul.msk.f32.gmra.mxu2 %vm68_vm0, %v59_v22  ;;  %573 = vmatmul.msk.f32.gmra.mxu3 %vm68_vm0, %v39_v23 }
  0x29   :  { %550 = vmatmul.msk.f32.gmra.mxu0 %vm68_vm0, %v52_v24 }
  0x2a   :  { %566 = vmatmul.msk.f32.gmra.mxu1 %vm68_vm0, %v32_v25 }
  0x2b   :  { %558 = vmatmul.msk.f32.gmra.mxu2 %vm68_vm0, %v60_v26  ;;  %574 = vmatmul.msk.f32.gmra.mxu3 %vm68_vm0, %v40_v27 }
  0x31   :  { %551 = vmatmul.msk.f32.gmra.mxu0 %vm68_vm0, %v53_v28 }
  0x32   :  { %567 = vmatmul.msk.f32.gmra.mxu1 %vm68_vm0, %v33_v29 }
  0x33   :  { %559 = vmatmul.msk.f32.gmra.mxu2 %vm68_vm0, %v61_v30  ;;  %575 = vmatmul.msk.f32.gmra.mxu3 %vm68_vm0, %v41_v31 }
  0x39   :  { %552 = vmatmul.msk.f32.gmra.mxu0 %vm68_vm0, %v54_v32 }
  0x3a   :  { %568 = vmatmul.msk.f32.gmra.mxu1 %vm68_vm0, %v34_v33 }
  0x3b   :  { %560 = vmatmul.msk.f32.gmra.mxu2 %vm68_vm0, %v62_v34  ;;  %576 = vmatmul.msk.f32.gmra.mxu3 %vm68_vm0, %v42_v35 }
  0x41   :  { %553 = vmatmul.msk.f32.gmra.mxu0 %vm68_vm0, %v55_v36 }
  0x42   :  { %569 = vmatmul.msk.f32.gmra.mxu1 %vm68_vm0, %v35_v37 }
  0x43   :  { %561 = vmatmul.msk.f32.gmra.mxu2 %vm68_vm0, %v63_v38  ;;  %577 = vmatmul.msk.f32.gmra.mxu3 %vm68_vm0, %v43_v39 }
  0x86   :  { %v134_v41 = vpop.f32.mrf.mxu0 }
  0x87   :  { %v247_v42 = vpop.f32.mrf.mxu1 }
  0x88   :  { %v248_v43 = vadd.f32 %v247_v42, %v134_v41 }
  0x8a   :  { %v299_v44 = vadd.f32 %v811_v40, %v248_v43 }
  0x8c   :  { %v331_v46 = vmul.f32 0.01, %v299_v44  ;;  %vm315_vm1 = vcmp.gt.f32.partialorder %v299_v44, 0.0 }
  0x8e   :  { %v347_v47 = vsel %vm315_vm1, %v299_v44, %v331_v46  ;;  %v137_v48 = vpop.f32.mrf.mxu0  ;;  %v158_v49 = vpop.f32.mrf.mxu2 }
  0x8f   :  { %v367_v50 = vmul.f32 %v817_v45, %v347_v47  ;;  %v250_v51 = vpop.f32.mrf.mxu1  ;;  %v271_v52 = vpop.f32.mrf.mxu3 }
  0x90   :  { %v251_v53 = vadd.f32 %v250_v51, %v137_v48  ;;  %v272_v54 = vadd.f32 %v271_v52, %v158_v49 }
  0x91   :  { %v383_v55 = vsel %vm68_vm0, %v367_v50, 0.0 }
  0x92   :  { %384 = vadd.xlane.f32.xlu0 %v383_v55  ;;  %v300_v56 = vadd.f32 %v811_v40, %v251_v53  ;;  %v307_v57 = vadd.f32 %v811_v40, %v272_v54 }
  0x94   :  { %v332_v58 = vmul.f32 0.01, %v300_v56  ;;  %v339_v59 = vmul.f32 0.01, %v307_v57  ;;  %vm323_vm2 = vcmp.gt.f32.partialorder %v307_v57, 0.0  ;;  %vm316_vm3 = vcmp.gt.f32.partialorder %v300_v56, 0.0 }
  0x96   :  { %v140_v60 = vpop.f32.mrf.mxu0  ;;  %v161_v61 = vpop.f32.mrf.mxu2  ;;  %v355_v62 = vsel %vm323_vm2, %v307_v57, %v339_v59  ;;  %v348_v63 = vsel %vm316_vm3, %v300_v56, %v332_v58  ;;  %vm474_vm2 = vcmask 195712   ;;  %vm478_vm3 = vcmask 261312  }
  0x97   :  { %v253_v0 = vpop.f32.mrf.mxu1  ;;  %v274_v1 = vpop.f32.mrf.mxu3  ;;  %v375_v2 = vmul.f32 %v817_v45, %v355_v62  ;;  %v368_v3 = vmul.f32 %v817_v45, %v348_v63 }
  0x98   :  { %v254_v4 = vadd.f32 %v253_v0, %v140_v60  ;;  %v275_v5 = vadd.f32 %v274_v1, %v161_v61 }
  0x99   :  { %v407_v6 = vsel %vm68_vm0, %v375_v2, 0.0  ;;  %v386_v7 = vsel %vm68_vm0, %v368_v3, 0.0 }
  0x9a   :  { %v301_v8 = vadd.f32 %v811_v40, %v254_v4  ;;  %v308_v9 = vadd.f32 %v811_v40, %v275_v5  ;;  %408 = vadd.xlane.f32.xlu2 %v407_v6  ;;  %387 = vadd.xlane.f32.xlu0 %v386_v7 }
  0x9c   :  { %v333_v10 = vmul.f32 0.01, %v301_v8  ;;  %v340_v11 = vmul.f32 0.01, %v308_v9  ;;  %vm317_vm4 = vcmp.gt.f32.partialorder %v301_v8, 0.0  ;;  %vm324_vm5 = vcmp.gt.f32.partialorder %v308_v9, 0.0 }
  0x9e   :  { %v143_v12 = vpop.f32.mrf.mxu0  ;;  %v164_v13 = vpop.f32.mrf.mxu2  ;;  %v349_v14 = vsel %vm317_vm4, %v301_v8, %v333_v10  ;;  %v356_v15 = vsel %vm324_vm5, %v308_v9, %v340_v11  ;;  %vm482_vm4 = vcmask 326912   ;;  %vm486_vm5 = vcmask 392512  }
  0x9f   :  { %v256_v16 = vpop.f32.mrf.mxu1  ;;  %v277_v17 = vpop.f32.mrf.mxu3  ;;  %v369_v18 = vmul.f32 %v817_v45, %v349_v14  ;;  %v376_v19 = vmul.f32 %v817_v45, %v356_v15 }
  0xa0   :  { %v257_v20 = vadd.f32 %v256_v16, %v143_v12  ;;  %v278_v21 = vadd.f32 %v277_v17, %v164_v13 }
  0xa1   :  { %v389_v22 = vsel %vm68_vm0, %v369_v18, 0.0  ;;  %v410_v23 = vsel %vm68_vm0, %v376_v19, 0.0 }
  0xa2   :  { %v302_v24 = vadd.f32 %v811_v40, %v257_v20  ;;  %v309_v25 = vadd.f32 %v811_v40, %v278_v21  ;;  %390 = vadd.xlane.f32.xlu1 %v389_v22  ;;  %411 = vadd.xlane.f32.xlu0 %v410_v23 }
  0xa4   :  { %v341_v26 = vmul.f32 0.01, %v309_v25  ;;  %vm325_vm6 = vcmp.gt.f32.partialorder %v309_v25, 0.0  ;;  %v334_v27 = vmul.f32 0.01, %v302_v24  ;;  %vm318_vm7 = vcmp.gt.f32.partialorder %v302_v24, 0.0 }
  0xa6   :  { %v146_v28 = vpop.f32.mrf.mxu0  ;;  %v167_v29 = vpop.f32.mrf.mxu2  ;;  %v357_v30 = vsel %vm325_vm6, %v309_v25, %v341_v26  ;;  %v350_v37 = vsel %vm318_vm7, %v302_v24, %v334_v27  ;;  %vm490_vm6 = vcmask 458112   ;;  %vm494_vm7 = vcmask 523712  }
  0xa7   :  { %v259_v31 = vpop.f32.mrf.mxu1  ;;  %v280_v32 = vpop.f32.mrf.mxu3  ;;  %v377_v33 = vmul.f32 %v817_v45, %v357_v30  ;;  %v370_v39 = vmul.f32 %v817_v45, %v350_v37 }
  0xa8   :  { %v260_v34 = vadd.f32 %v259_v31, %v146_v28  ;;  %v281_v41 = vadd.f32 %v280_v32, %v167_v29 }
  0xa9   :  { %v413_v35 = vsel %vm68_vm0, %v377_v33, 0.0  ;;  %v392_v51 = vsel %vm68_vm0, %v370_v39, 0.0 }
  0xaa   :  { %v303_v36 = vadd.f32 %v811_v40, %v260_v34  ;;  %414 = vadd.xlane.f32.xlu1 %v413_v35  ;;  %v310_v52 = vadd.f32 %v811_v40, %v281_v41 }
  0xac   :  { %v335_v38 = vmul.f32 0.01, %v303_v36  ;;  %vm319_vm8 = vcmp.gt.f32.partialorder %v303_v36, 0.0  ;;  %v342_v55 = vmul.f32 0.01, %v310_v52  ;;  %vm326_vm10 = vcmp.gt.f32.partialorder %v310_v52, 0.0 }
  0xae   :  { %v149_v42 = vpop.f32.mrf.mxu0  ;;  %v170_v43 = vpop.f32.mrf.mxu2  ;;  %v351_v44 = vsel %vm319_vm8, %v303_v36, %v335_v38  ;;  %v358_v2 = vsel %vm326_vm10, %v310_v52, %v342_v55  ;;  %vm498_vm8 = vcmask 589312   ;;  %vm506_vm10 = vcmask 720512  }
  0xaf   :  { %v262_v46 = vpop.f32.mrf.mxu1  ;;  %v283_v47 = vpop.f32.mrf.mxu3  ;;  %v371_v48 = vmul.f32 %v817_v45, %v351_v44  ;;  %v378_v5 = vmul.f32 %v817_v45, %v358_v2 }
  0xb0   :  { %v263_v49 = vadd.f32 %v262_v46, %v149_v42  ;;  %v284_v59 = vadd.f32 %v283_v47, %v170_v43 }
  0xb1   :  { %v395_v50 = vsel %vm68_vm0, %v371_v48, 0.0  ;;  %v416_v16 = vsel %vm68_vm0, %v378_v5, 0.0 }
  0xb2   :  { %v304_v53 = vadd.f32 %v811_v40, %v263_v49  ;;  %396 = vadd.xlane.f32.xlu2 %v395_v50  ;;  %393 = vadd.xlane.f32.xlu1 %v392_v51  ;;  %v311_v3 = vadd.f32 %v811_v40, %v284_v59  ;;  %v465_v51 = vlaneseq }
  0xb4   :  { %v336_v54 = vmul.f32 0.01, %v304_v53  ;;  %vm320_vm9 = vcmp.gt.f32.partialorder %v304_v53, 0.0  ;;  %v343_v10 = vmul.f32 0.01, %v311_v3  ;;  %vm327_vm12 = vcmp.gt.f32.partialorder %v311_v3, 0.0 }
  0xb6   :  { %v152_v56 = vpop.f32.mrf.mxu0  ;;  %v173_v57 = vpop.f32.mrf.mxu2  ;;  %v352_v58 = vsel %vm320_vm9, %v304_v53, %v336_v54  ;;  %v359_v21 = vsel %vm327_vm12, %v311_v3, %v343_v10  ;;  %v866_v54 = vand.u32 127, %v465_v51  ;;  %vm502_vm9 = vcmask 654912  }
  0xb7   :  { %v265_v60 = vpop.f32.mrf.mxu1  ;;  %v286_v61 = vpop.f32.mrf.mxu3  ;;  %v372_v62 = vmul.f32 %v817_v45, %v352_v58  ;;  %v379_v28 = vmul.f32 %v817_v45, %v359_v21  ;;  %vm514_vm12 = vcmask 851712  }
  0xb8   :  { %v266_v63 = vadd.f32 %v265_v60, %v152_v56  ;;  %v287_v6 = vadd.f32 %v286_v61, %v173_v57  ;;  %v468_v56 = vadd.s32 4294967288, %v866_v54  ;;  %v472_v58 = vadd.s32 4294967280, %v866_v54 }
  0xb9   :  { %v398_v0 = vsel %vm68_vm0, %v372_v62, 0.0  ;;  %v419_v36 = vsel %vm68_vm0, %v379_v28, 0.0  ;;  %v476_v61 = vadd.s32 4294967272, %v866_v54  ;;  %v480_v2 = vadd.s32 4294967264, %v866_v54 }
  0xba   :  { %v305_v1 = vadd.f32 %v811_v40, %v266_v63  ;;  %399 = vadd.xlane.f32.xlu2 %v398_v0  ;;  %v312_v18 = vadd.f32 %v811_v40, %v287_v6  ;;  %v484_v6 = vadd.s32 4294967256, %v866_v54  ;;  %v508_v28 = vadd.s32 4294967208, %v866_v54 }
  0xbb   :  { %v524_v51 = vadd.s32 4294967176, %v866_v54 }
  0xbc   :  { %v337_v4 = vmul.f32 0.01, %v305_v1  ;;  %vm321_vm11 = vcmp.gt.f32.partialorder %v305_v1, 0.0  ;;  %v344_v24 = vmul.f32 0.01, %v312_v18  ;;  %vm328_vm15 = vcmp.gt.f32.partialorder %v312_v18, 0.0 }
  0xbe   :  { %v155_v7 = vpop.f32.mrf.mxu0  ;;  %v176_v8 = vpop.f32.mrf.mxu2  ;;  %v353_v9 = vsel %vm321_vm11, %v305_v1, %v337_v4  ;;  %v360_v37 = vsel %vm328_vm15, %v312_v18, %v344_v24  ;;  %vm510_vm11 = vcmask 786112   ;;  %vm526_vm15 = vcmask 1048512  }
  0xbf   :  { %v268_v11 = vpop.f32.mrf.mxu1  ;;  %v289_v12 = vpop.f32.mrf.mxu3  ;;  %v373_v13 = vmul.f32 %v817_v45, %v353_v9  ;;  %v380_v39 = vmul.f32 %v817_v45, %v360_v37  ;;  %v488_v9 = vadd.s32 4294967248, %v866_v54  ;;  %v512_v37 = vadd.s32 4294967200, %v866_v54 }
  0xc0   :  { %v269_v14 = vadd.f32 %v268_v11, %v155_v7  ;;  %v290_v15 = vadd.f32 %v289_v12, %v176_v8  ;;  %v496_v12 = vadd.s32 4294967232, %v866_v54 }
  0xc1   :  { %v401_v17 = vsel %vm68_vm0, %v373_v13, 0.0  ;;  %v422_v43 = vsel %vm68_vm0, %v380_v39, 0.0 }
  0xc2   :  { %v306_v19 = vadd.f32 %v811_v40, %v269_v14  ;;  %v313_v20 = vadd.f32 %v811_v40, %v290_v15  ;;  %417 = vadd.xlane.f32.xlu2 %v416_v16  ;;  %402 = vadd.xlane.f32.xlu0 %v401_v17  ;;  %v492_v17 = vadd.s32 4294967240, %v866_v54 }
  0xc4   :  { %v338_v22 = vmul.f32 0.01, %v306_v19  ;;  %v345_v23 = vmul.f32 0.01, %v313_v20  ;;  %vm329_vm13 = vcmp.gt.f32.partialorder %v313_v20, 0.0  ;;  %vm322_vm14 = vcmp.gt.f32.partialorder %v306_v19, 0.0 }
  0xc6   :  { %v179_v25 = vpop.f32.mrf.mxu2  ;;  %v361_v26 = vsel %vm329_vm13, %v313_v20, %v345_v23  ;;  %v354_v27 = vsel %vm322_vm14, %v306_v19, %v338_v22  ;;  %v500_v19 = vadd.s32 4294967224, %v866_v54  ;;  %v504_v23 = vadd.s32 4294967216, %v866_v54 }
  0xc7   :  { %v292_v29 = vpop.f32.mrf.mxu3  ;;  %v381_v30 = vmul.f32 %v817_v45, %v361_v26  ;;  %v374_v31 = vmul.f32 %v817_v45, %v354_v27  ;;  %vm518_vm13 = vcmask 917312   ;;  %vm522_vm14 = vcmask 982912  }
  0xc8   :  { %v293_v32 = vadd.f32 %v292_v29, %v179_v25 }
  0xc9   :  { %v425_v33 = vsel %vm68_vm0, %v381_v30, 0.0  ;;  %v404_v34 = vsel %vm68_vm0, %v374_v31, 0.0 }
  0xca   :  { %v314_v35 = vadd.f32 %v811_v40, %v293_v32  ;;  %426 = vadd.xlane.f32.xlu2 %v425_v33  ;;  %405 = vadd.xlane.f32.xlu1 %v404_v34 }
  0xcb   :  { %420 = vadd.xlane.f32.xlu0 %v419_v36 }
  0xcc   :  { %v346_v38 = vmul.f32 0.01, %v314_v35  ;;  %vm330_vm1 = vcmp.gt.f32.partialorder %v314_v35, 0.0 }
  0xce   :  { %v362_v41 = vsel %vm330_vm1, %v314_v35, %v346_v38 }
  0xcf   :  { %v382_v42 = vmul.f32 %v817_v45, %v362_v41  ;;  %v871_v45 = vstv %s914_s6  ;;  %s615_s6 = smov [#allocation3]  }
  0xd0   :  { %s535_s8 = sshll.u32 %s615_s6, 4  ;;  %s536_s8 = int_to_ptr.vmem [resolvable:$true] %s535_s8 }
  0xd1   :  { %v428_v44 = vsel %vm68_vm0, %v382_v42, 0.0  ;;  %vm470_vm0 = vcmask 130112  }
  0xd2   :  { %423 = vadd.xlane.f32.xlu1 %v422_v43 }
  0xd3   :  { %429 = vadd.xlane.f32.xlu0 %v428_v44  ;;  %v516_v44 = vadd.s32 4294967192, %v866_v54 }
 0x105   :  { %v385_v40 = vpop.xlane.xlu0 %384 }
 0x106   :  { %v433_v60 = vadd.f32 %v871_v45, %v385_v40  ;;  %v520_v40 = vadd.s32 4294967184, %v866_v54 }
 0x108   :  { %v467_v4 = vperm.slane %v433_v60, %v866_v54 }
 0x10d   :  { %v409_v46 = vpop.xlane.xlu2 %408  ;;  %v388_v48 = vpop.xlane.xlu0 %387 }
 0x10e   :  { %v434_v57 = vadd.f32 %v871_v45, %v388_v48  ;;  %v441_v18 = vadd.f32 %v871_v45, %v409_v46 }
 0x110   :  { %v469_v0 = vperm.slane %v434_v57, %v468_v56  ;;  %v497_v32 = vperm.slane %v441_v18, %v496_v12 }
 0x112   :  { %v471_v11 = vsel %vm470_vm0, %v469_v0, %v467_v4 }
 0x115   :  { %v391_v47 = vpop.xlane.xlu1 %390  ;;  %v412_v52 = vpop.xlane.xlu0 %411 }
 0x116   :  { %v435_v59 = vadd.f32 %v871_v45, %v391_v47  ;;  %v442_v22 = vadd.f32 %v871_v45, %v412_v52 }
 0x118   :  { %v473_v1 = vperm.slane %v435_v59, %v472_v58  ;;  %v501_v34 = vperm.slane %v442_v22, %v500_v19 }
 0x11a   :  { %v475_v13 = vsel %vm474_vm2, %v473_v1, %v471_v11 }
 0x11d   :  { %v415_v50 = vpop.xlane.xlu1 %414 }
 0x11e   :  { %v443_v26 = vadd.f32 %v871_v45, %v415_v50 }
 0x120   :  { %v505_v38 = vperm.slane %v443_v26, %v504_v23 }
 0x125   :  { %v397_v49 = vpop.xlane.xlu2 %396  ;;  %v394_v55 = vpop.xlane.xlu1 %393 }
 0x126   :  { %v436_v62 = vadd.f32 %v871_v45, %v394_v55  ;;  %v437_v3 = vadd.f32 %v871_v45, %v397_v49 }
 0x128   :  { %v477_v5 = vperm.slane %v436_v62, %v476_v61  ;;  %v481_v14 = vperm.slane %v437_v3, %v480_v2 }
 0x12a   :  { %v479_v15 = vsel %vm478_vm3, %v477_v5, %v475_v13 }
 0x12b   :  { %v483_v27 = vsel %vm482_vm4, %v481_v14, %v479_v15 }
 0x12d   :  { %v400_v53 = vpop.xlane.xlu2 %399 }
 0x12e   :  { %v438_v7 = vadd.f32 %v871_v45, %v400_v53 }
 0x130   :  { %v485_v16 = vperm.slane %v438_v7, %v484_v6 }
 0x132   :  { %v487_v29 = vsel %vm486_vm5, %v485_v16, %v483_v27 }
 0x135   :  { %v403_v63 = vpop.xlane.xlu0 %402  ;;  %v418_v8 = vpop.xlane.xlu2 %417 }
 0x136   :  { %v439_v10 = vadd.f32 %v871_v45, %v403_v63  ;;  %v444_v30 = vadd.f32 %v871_v45, %v418_v8 }
 0x138   :  { %v489_v20 = vperm.slane %v439_v10, %v488_v9  ;;  %v509_v42 = vperm.slane %v444_v30, %v508_v28 }
 0x13a   :  { %v491_v33 = vsel %vm490_vm6, %v489_v20, %v487_v29 }
 0x13d   :  { %v406_v21 = vpop.xlane.xlu1 %405  ;;  %v427_v35 = vpop.xlane.xlu2 %426 }
 0x13e   :  { %v440_v24 = vadd.f32 %v871_v45, %v406_v21  ;;  %v421_v25 = vpop.xlane.xlu0 %420  ;;  %v447_v46 = vadd.f32 %v871_v45, %v427_v35 }
 0x13f   :  { %v445_v41 = vadd.f32 %v871_v45, %v421_v25 }
 0x140   :  { %v493_v31 = vperm.slane %v440_v24, %v492_v17  ;;  %v521_v57 = vperm.slane %v447_v46, %v520_v40 }
 0x141   :  { %v513_v53 = vperm.slane %v445_v41, %v512_v37 }
 0x142   :  { %v495_v36 = vsel %vm494_vm7, %v493_v31, %v491_v33 }
 0x143   :  { %v499_v39 = vsel %vm498_vm8, %v497_v32, %v495_v36 }
 0x144   :  { %v503_v43 = vsel %vm502_vm9, %v501_v34, %v499_v39 }
 0x145   :  { %v507_v47 = vsel %vm506_vm10, %v505_v38, %v503_v43  ;;  %v424_v48 = vpop.xlane.xlu1 %423 }
 0x146   :  { %v511_v49 = vsel %vm510_vm11, %v509_v42, %v507_v47  ;;  %v446_v50 = vadd.f32 %v871_v45, %v424_v48  ;;  %v430_v52 = vpop.xlane.xlu0 %429 }
 0x147   :  { %v448_v55 = vadd.f32 %v871_v45, %v430_v52  ;;  %v515_v58 = vsel %vm514_vm12, %v513_v53, %v511_v49 }
 0x148   :  { %v517_v56 = vperm.slane %v446_v50, %v516_v44 }
 0x149   :  { %v525_v60 = vperm.slane %v448_v55, %v524_v51 }
 0x14a   :  { %v519_v59 = vsel %vm518_vm13, %v517_v56, %v515_v58 }
 0x14b   :  { %v523_v61 = vsel %vm522_vm14, %v521_v57, %v519_v59 }
 0x14c   :  { %v527_v54 = vsel %vm526_vm15, %v525_v60, %v523_v61 }
 0x14d   :  { %529 = vst [vmem:[#allocation3] sm:$0x1] %v527_v54 }
 0x14e   :  { %540 = dma.vmem_to_hbm [thread:$0]  %s536_s8, 16, %s538_s11, [#allocation4]  }
 0x14f   :  { %613 = dma.done.wait [#allocation4], 16  }
 0x150   :  { %614 = vsyncadd [#allocation4], 4294967280 }
 0x151   :  { %545 = vsyncpa [#allocation4], 1 }

</bundles_post_ra>
